<compile_context>
chip_gen: v5e
topology: v5e:2x2
jax: 0.10.0
libtpu: 0.0.40
codegen_flags: <defaults>
</compile_context>

<pallas_src>
import functools
import math

import jax
import jax.numpy as jnp
from jax.experimental import pallas as pl
from jax.experimental.pallas import tpu as pltpu

_LANE = 128      # vreg lane width
_SUBLANE = 8     # vreg sublane count


def _round_up(x, m):
    return ((x + m - 1) // m) * m


def _fused_mlp_kernel(*refs, num_layers):
    """refs = (x_ref, w0, b0, w1, b1, ..., w_{L-1}, b_{L-1}, o_ref).

    x block:   (TM, D0_pad)            float32
    w_i block: (D_i_pad, D_{i+1}_pad)  bfloat16, full array, VMEM resident
    b_i block: (1, D_{i+1}_pad)        float32
    o block:   (TM, D_L_pad)           float32
    """
    x_ref = refs[0]
    o_ref = refs[-1]
    h = x_ref[...].astype(jnp.float32)
    for i in range(num_layers):
        w_ref = refs[1 + 2 * i]
        b_ref = refs[2 + 2 * i]
        # bf16 MXU operands, f32 accumulation; bias broadcast (1, N) over (TM, N).
        h = jnp.dot(h.astype(jnp.bfloat16), w_ref[...],
                    preferred_element_type=jnp.float32)
        h = h + b_ref[...]
        if i < num_layers - 1:
            h = jnp.tanh(h)          # hidden activation (EUP)
    o_ref[...] = h.astype(o_ref.dtype)


def pack_mlp_params(params, input_dim):
    """One-time packing: zero-pad feature dims to multiples of 128.

    Weights -> bf16 (MXU operand dtype), biases -> f32 (post-accumulation add).
    Done once, outside the forward path (no per-call HBM padding traffic).
    """
    dims = [input_dim] + [w.shape[1] for (w, _) in params]
    pdims = [_round_up(d, _LANE) for d in dims]
    ws, bs = [], []
    for i, (w, b) in enumerate(params):
        wp = (jnp.zeros((pdims[i], pdims[i + 1]), jnp.bfloat16)
              .at[:dims[i], :dims[i + 1]].set(w.astype(jnp.bfloat16)))
        bp = (jnp.zeros((1, pdims[i + 1]), jnp.float32)
              .at[0, :dims[i + 1]].set(b.astype(jnp.float32)))
        ws.append(wp)
        bs.append(bp)
    return {"weights": tuple(ws), "biases": tuple(bs),
            "dims": tuple(dims), "pdims": tuple(pdims)}


def mlp_forward(x, packed):
    """Forward pass of the whole MLP in a single fused Pallas kernel."""
    ws, bs = packed["weights"], packed["biases"]
    dims, pdims = packed["dims"], packed["pdims"]
    num_layers = len(ws)
    batch, in_dim = x.shape
    assert in_dim == dims[0], "input feature dim mismatch"

    # Batch tile policy:
    #  - big batches: 512-row tiles (amortize per-step overhead, fill MXU rows)
    #  - mid batches: split into >= 2 grid steps so both v7x TCs get work
    #  - tiny batches: one sublane-aligned block
    if batch >= 1024:
        tm = 512
    elif batch >= 16:
        tm = min(512, _round_up(-(-batch // 2), _SUBLANE))
    else:
        tm = _round_up(max(batch, 1), _SUBLANE)
    batch_p = _round_up(batch, tm)

    f32 = jnp.float32
    if batch_p == batch and pdims[0] == in_dim and x.dtype == f32:
        x_p = x                                   # already aligned: no pad copy
    else:
        x_p = (jnp.zeros((batch_p, pdims[0]), f32)
               .at[:batch, :in_dim].set(x.astype(f32)))

    grid = (batch_p // tm,)

    in_specs = [pl.BlockSpec((tm, pdims[0]), lambda i: (i, 0))]   # batch-tiled x
    flat_inputs = [x_p]
    for wp, bp in zip(ws, bs):
        # Constant index_map across the grid -> single-buffer (halves weight VMEM).
        in_specs.append(pl.BlockSpec(wp.shape, lambda i: (0, 0),
                                     pipeline_mode=pl.Buffered(1)))
        in_specs.append(pl.BlockSpec(bp.shape, lambda i: (0, 0),
                                     pipeline_mode=pl.Buffered(1)))
        flat_inputs += [wp, bp]

    out_specs = pl.BlockSpec((tm, pdims[-1]), lambda i: (i, 0))

    # Explicit VMEM budget: double-buffered x/out tiles + single-buffered
    # weights/biases + live f32 intermediate, with 50% headroom.
    bytes_x = 2 * tm * pdims[0] * 4
    bytes_o = 2 * tm * pdims[-1] * 4
    bytes_wb = sum(w.size * 2 for w in ws) + sum(b.size * 4 for b in bs)
    bytes_live = 2 * tm * max(pdims) * 4
    vmem_limit = int(min(128 << 20,
                         max(32 << 20,
                             1.5 * (bytes_x + bytes_o + bytes_wb + bytes_live))))

    # CostEstimate on TRUE (unpadded) dims.
    flops = 2 * batch * sum(dims[i] * dims[i + 1] for i in range(num_layers))
    transcendentals = batch * sum(dims[i + 1] for i in range(num_layers - 1))
    bytes_accessed = (batch * dims[0] * 4
                      + sum(dims[i] * dims[i + 1] * 2 + dims[i + 1] * 4
                            for i in range(num_layers))
                      + batch * dims[-1] * 4)

    kernel = functools.partial(_fused_mlp_kernel, num_layers=num_layers)

    out_p = pl.pallas_call(
        kernel,
        out_shape=jax.ShapeDtypeStruct((batch_p, pdims[-1]), f32),
        grid=grid,
        in_specs=in_specs,
        out_specs=out_specs,
        compiler_params=pltpu.CompilerParams(
            dimension_semantics=("parallel",),        # megacore over batch tiles
            vmem_limit_bytes=vmem_limit),
        cost_estimate=pl.CostEstimate(
            flops=int(flops),
            transcendentals=int(transcendentals),
            bytes_accessed=int(bytes_accessed)),
    )(*flat_inputs)

    # Strip padding back to the true output shape.
    return out_p[:batch, :dims[-1]]


def init_mlp_params(key, input_dim, hidden_dims, output_dim, dtype=jnp.float32):
    """Deterministic init mirroring nn.Linear default (uniform +-1/sqrt(fan_in))."""
    dims = [input_dim] + list(hidden_dims) + [output_dim]
    params = []
    for i in range(len(dims) - 1):
        fan_in, fan_out = dims[i], dims[i + 1]
        key, kw, kb = jax.random.split(key, 3)
        bound = 1.0 / math.sqrt(fan_in)
        w = jax.random.uniform(kw, (fan_in, fan_out), dtype, -bound, bound)
        b = jax.random.uniform(kb, (fan_out,), dtype, -bound, bound)
        params.append((w, b))
    return params


if __name__ == "__main__":
    key = jax.random.PRNGKey(0)
    batch = 8
    input_dim = 32
    hidden_dims = [32, 32]
    output_dim = 16

    k_x, k_p = jax.random.split(key)
    x = jax.random.normal(k_x, (batch, input_dim), dtype=jnp.float32)
    params = init_mlp_params(k_p, input_dim, hidden_dims, output_dim)

    packed = pack_mlp_params(params, input_dim)
    out = mlp_forward(x, packed)
    jax.block_until_ready(out)

    # Reference with identical bf16-operand / f32-accumulate math.
    ref = x.astype(jnp.float32)
    for i, (w, b) in enumerate(params):
        ref = jnp.dot(ref.astype(jnp.bfloat16), w.astype(jnp.bfloat16),
                      preferred_element_type=jnp.float32) + b.astype(jnp.float32)
        if i < len(params) - 1:
            ref = jnp.tanh(ref)

    assert out.shape == (batch, output_dim)
    assert jnp.allclose(out, ref, atol=1e-3, rtol=1e-3), "mismatch vs reference"

    print("KERNEL_OK")
</pallas_src>

<mosaic_0001>
module attributes {stable_mosaic.version = 11 : i64} {
  func.func @_fused_mlp_kernel(%arg0: i32, %arg1: memref<8x128xf32, #tpu.memory_space<vmem>>, %arg2: memref<128x128xbf16, #tpu.memory_space<vmem>>, %arg3: memref<1x128xf32, #tpu.memory_space<vmem>>, %arg4: memref<128x128xbf16, #tpu.memory_space<vmem>>, %arg5: memref<1x128xf32, #tpu.memory_space<vmem>>, %arg6: memref<128x128xbf16, #tpu.memory_space<vmem>>, %arg7: memref<1x128xf32, #tpu.memory_space<vmem>>, %arg8: memref<8x128xf32, #tpu.memory_space<vmem>>) attributes {dimension_semantics = [#tpu.dimension_semantics<parallel>], iteration_bounds = array<i64: 1>, scalar_prefetch = 0 : i64, scratch_operands = 0 : i64, tpu.core_type = #tpu.core_type<tc>, window_params = [{transform_indices = @transform_0, window_bounds = array<i64: 8, 128>}, {pipeline_mode = #tpu.pipeline_mode<synchronous>, transform_indices = @transform_1, window_bounds = array<i64: 128, 128>}, {pipeline_mode = #tpu.pipeline_mode<synchronous>, transform_indices = @transform_2, window_bounds = array<i64: 1, 128>}, {pipeline_mode = #tpu.pipeline_mode<synchronous>, transform_indices = @transform_3, window_bounds = array<i64: 128, 128>}, {pipeline_mode = #tpu.pipeline_mode<synchronous>, transform_indices = @transform_4, window_bounds = array<i64: 1, 128>}, {pipeline_mode = #tpu.pipeline_mode<synchronous>, transform_indices = @transform_5, window_bounds = array<i64: 128, 128>}, {pipeline_mode = #tpu.pipeline_mode<synchronous>, transform_indices = @transform_6, window_bounds = array<i64: 1, 128>}, {transform_indices = @transform_7, window_bounds = array<i64: 8, 128>}]} {
    %c0 = arith.constant 0 : index
    %c0_0 = arith.constant 0 : index
    %0 = vector.load %arg1[%c0, %c0_0] : memref<8x128xf32, #tpu.memory_space<vmem>>, vector<8x128xf32>
    %1 = arith.truncf %0 : vector<8x128xf32> to vector<8x128xbf16>
    %c0_1 = arith.constant 0 : index
    %c0_2 = arith.constant 0 : index
    %2 = vector.load %arg2[%c0_1, %c0_2] : memref<128x128xbf16, #tpu.memory_space<vmem>>, vector<128x128xbf16>
    %cst = arith.constant dense<0.000000e+00> : vector<8x128xf32>
    %3 = tpu.matmul %1, %2, %cst {dimension_numbers = #tpu.dot_dimension_numbers<[1], [0], [0], [1], [0, 0, 1, 1], [], []>} : vector<8x128xbf16>, vector<128x128xbf16>, vector<8x128xf32> -> vector<8x128xf32>
    %c0_3 = arith.constant 0 : index
    %c0_4 = arith.constant 0 : index
    %4 = vector.load %arg3[%c0_3, %c0_4] : memref<1x128xf32, #tpu.memory_space<vmem>>, vector<1x128xf32>
    %5 = vector.broadcast %4 : vector<1x128xf32> to vector<8x128xf32>
    %6 = arith.addf %3, %5 : vector<8x128xf32>
    %7 = math.tanh %6 : vector<8x128xf32>
    %8 = arith.truncf %7 : vector<8x128xf32> to vector<8x128xbf16>
    %c0_5 = arith.constant 0 : index
    %c0_6 = arith.constant 0 : index
    %9 = vector.load %arg4[%c0_5, %c0_6] : memref<128x128xbf16, #tpu.memory_space<vmem>>, vector<128x128xbf16>
    %cst_7 = arith.constant dense<0.000000e+00> : vector<8x128xf32>
    %10 = tpu.matmul %8, %9, %cst_7 {dimension_numbers = #tpu.dot_dimension_numbers<[1], [0], [0], [1], [0, 0, 1, 1], [], []>} : vector<8x128xbf16>, vector<128x128xbf16>, vector<8x128xf32> -> vector<8x128xf32>
    %c0_8 = arith.constant 0 : index
    %c0_9 = arith.constant 0 : index
    %11 = vector.load %arg5[%c0_8, %c0_9] : memref<1x128xf32, #tpu.memory_space<vmem>>, vector<1x128xf32>
    %12 = vector.broadcast %11 : vector<1x128xf32> to vector<8x128xf32>
    %13 = arith.addf %10, %12 : vector<8x128xf32>
    %14 = math.tanh %13 : vector<8x128xf32>
    %15 = arith.truncf %14 : vector<8x128xf32> to vector<8x128xbf16>
    %c0_10 = arith.constant 0 : index
    %c0_11 = arith.constant 0 : index
    %16 = vector.load %arg6[%c0_10, %c0_11] : memref<128x128xbf16, #tpu.memory_space<vmem>>, vector<128x128xbf16>
    %cst_12 = arith.constant dense<0.000000e+00> : vector<8x128xf32>
    %17 = tpu.matmul %15, %16, %cst_12 {dimension_numbers = #tpu.dot_dimension_numbers<[1], [0], [0], [1], [0, 0, 1, 1], [], []>} : vector<8x128xbf16>, vector<128x128xbf16>, vector<8x128xf32> -> vector<8x128xf32>
    %c0_13 = arith.constant 0 : index
    %c0_14 = arith.constant 0 : index
    %18 = vector.load %arg7[%c0_13, %c0_14] : memref<1x128xf32, #tpu.memory_space<vmem>>, vector<1x128xf32>
    %19 = vector.broadcast %18 : vector<1x128xf32> to vector<8x128xf32>
    %20 = arith.addf %17, %19 : vector<8x128xf32>
    %c0_15 = arith.constant 0 : index
    %c0_16 = arith.constant 0 : index
    %21 = vector.load %arg8[%c0_15, %c0_16] : memref<8x128xf32, #tpu.memory_space<vmem>>, vector<8x128xf32>
    tpu.vector_store %arg8[%c0_15, %c0_16], %20 {strides = array<i32>} : memref<8x128xf32, #tpu.memory_space<vmem>>, vector<8x128xf32>,
    return
  }
  func.func @transform_0(%arg0: i32) -> (i32, i32) {
    %c0_i32 = arith.constant 0 : i32
    %c0_i32_0 = arith.constant 0 : i32
    return %arg0, %c0_i32 : i32, i32
  }
  func.func @transform_1(%arg0: i32) -> (i32, i32) {
    %c0_i32 = arith.constant 0 : i32
    %c0_i32_0 = arith.constant 0 : i32
    %c0_i32_1 = arith.constant 0 : i32
    return %c0_i32, %c0_i32_0 : i32, i32
  }
  func.func @transform_2(%arg0: i32) -> (i32, i32) {
    %c0_i32 = arith.constant 0 : i32
    %c0_i32_0 = arith.constant 0 : i32
    %c0_i32_1 = arith.constant 0 : i32
    return %c0_i32, %c0_i32_0 : i32, i32
  }
  func.func @transform_3(%arg0: i32) -> (i32, i32) {
    %c0_i32 = arith.constant 0 : i32
    %c0_i32_0 = arith.constant 0 : i32
    %c0_i32_1 = arith.constant 0 : i32
    return %c0_i32, %c0_i32_0 : i32, i32
  }
  func.func @transform_4(%arg0: i32) -> (i32, i32) {
    %c0_i32 = arith.constant 0 : i32
    %c0_i32_0 = arith.constant 0 : i32
    %c0_i32_1 = arith.constant 0 : i32
    return %c0_i32, %c0_i32_0 : i32, i32
  }
  func.func @transform_5(%arg0: i32) -> (i32, i32) {
    %c0_i32 = arith.constant 0 : i32
    %c0_i32_0 = arith.constant 0 : i32
    %c0_i32_1 = arith.constant 0 : i32
    return %c0_i32, %c0_i32_0 : i32, i32
  }
  func.func @transform_6(%arg0: i32) -> (i32, i32) {
    %c0_i32 = arith.constant 0 : i32
    %c0_i32_0 = arith.constant 0 : i32
    %c0_i32_1 = arith.constant 0 : i32
    return %c0_i32, %c0_i32_0 : i32, i32
  }
  func.func @transform_7(%arg0: i32) -> (i32, i32) {
    %c0_i32 = arith.constant 0 : i32
    %c0_i32_0 = arith.constant 0 : i32
    return %arg0, %c0_i32 : i32, i32
  }
}

</mosaic_0001>

<bundles_post_ra>
// kernel: tpu_custom_call.1
= control target key start
LH: loop header
LB: loop body
LE: loop exit
PB: predicated region body
PF: predicated region fallthrough
CT: control target
= control target key end

     0   :  { %12 = vsyncpa [#allocation3], 0  ;;  %s690_s0 = inlined_call_operand.hbm [shape: f32[8,128], index: 0, kind: input, shape index: {}]   ;;  %s691_s1 = inlined_call_operand.hbm [shape: bf16[128,128], index: 1, kind: input, shape index: {}]   ;;  %s692_s2 = inlined_call_operand.vmem [shape: f32[1,128], index: 2, kind: input, shape index: {}]   ;;  %s693_s3 = inlined_call_operand.hbm [shape: bf16[128,128], index: 3, kind: input, shape index: {}]   ;;  %s694_s4 = inlined_call_operand.vmem [shape: f32[1,128], index: 4, kind: input, shape index: {}]   ;;  %s695_s5 = inlined_call_operand.hbm [shape: bf16[128,128], index: 5, kind: input, shape index: {}]   ;;  %s696_s6 = inlined_call_operand.vmem [shape: f32[1,128], index: 6, kind: input, shape index: {}]   ;;  %s697_s7 = inlined_call_operand.hbm [shape: f32[8,128], index: 7, kind: output, shape index: {}]  }
   0x1   :  { %13 = vsyncpa [#allocation6], 0 }
   0x2   :  { %14 = vsyncpa [#allocation9], 0  ;;  %s31_s26 = sshll.u32 %s691_s1, 4  ;;  %s32_s26 = int_to_ptr.hbm [resolvable:$true] %s31_s26 }
   0x3   :  { %15 = vsyncpa [#allocation4], 0  ;;  %s619_s27 = smov [#allocation5]   ;;  %s21_s8 = sshll.u32 %s690_s0, 4  ;;  %s22_s8 = int_to_ptr.hbm [resolvable:$true] %s21_s8 }
   0x4   :  { %s33_s28 = sshll.u32 %s619_s27, 4  ;;  %s620_s9 = smov 64   ;;  %s34_s28 = int_to_ptr.vmem [resolvable:$true] %s33_s28 }
   0x5   :  { %s621_s10 = smov 4   ;;  %s622_s11 = smov [#allocation2]  }
   0x6   :  { %39 = dma.hbm_to_vmem [thread:$0]  %s32_s26, 1024, %s34_s28, [#allocation6], %s620_s9, %s620_s9, %s621_s10  }
   0x7   :  { %s23_s12 = sshll.u32 %s622_s11, 4  ;;  %s46_s15 = sshll.u32 %s693_s3, 4  ;;  %s24_s12 = int_to_ptr.vmem [resolvable:$true] %s23_s12  ;;  %s47_s15 = int_to_ptr.hbm [resolvable:$true] %s46_s15 }
   0x8   :  { %26 = dma.hbm_to_vmem [thread:$0]  %s22_s8, 128, %s24_s12, [#allocation3]  }
   0x9   :  { %s61_s17 = sshll.u32 %s695_s5, 4  ;;  %s623_s18 = smov [#allocation7]   ;;  %s62_s17 = int_to_ptr.hbm [resolvable:$true] %s61_s17 }
   0xa   :  { %s48_s19 = sshll.u32 %s623_s18, 4  ;;  %s624_s0 = smov [#allocation8]   ;;  %s49_s19 = int_to_ptr.vmem [resolvable:$true] %s48_s19 }
   0xb   :  { %54 = dma.hbm_to_vmem [thread:$0]  %s47_s15, 1024, %s49_s19, [#allocation6], %s620_s9, %s620_s9, %s621_s10  }
   0xc   :  { %s63_s20 = sshll.u32 %s624_s0, 4  ;;  %s64_s20 = int_to_ptr.vmem [resolvable:$true] %s63_s20 }
   0xd   :  { %69 = dma.hbm_to_vmem [thread:$0]  %s62_s17, 1024, %s64_s20, [#allocation9], %s620_s9, %s620_s9, %s621_s10  }
   0xe   :  { %611 = dma.done.wait [#allocation3], 128  }
   0xf   :  { %612 = vsyncadd [#allocation3], 4294967168 }
  0x10   :  { %613 = dma.done.wait [#allocation6], 2048  }
  0x11   :  { %614 = vsyncadd [#allocation6], 4294965248 }
  0x12   :  { %615 = dma.done.wait [#allocation9], 1024  }
  0x13   :  { %616 = vsyncadd [#allocation9], 4294966272  ;;  %v460_v0 = vld [vmem:[#allocation5 + $0x38] sm:$0xff]  ;;  %v459_v1 = vld [vmem:[#allocation5 + $0x30] sm:$0xff]  ;;  %s625_s24 = smov [#allocation10]   ;;  %s345_s28 = sshll.u32 %s697_s7, 4  ;;  %s346_s28 = int_to_ptr.hbm [resolvable:$true] %s345_s28 }
  0x14   :  { %158 = vmatpush.bf16.msra.mxu0 %v460_v0  ;;  %v468_v2 = vld [vmem:[#allocation7 + $0x38] sm:$0xff]  ;;  %v467_v3 = vld [vmem:[#allocation7 + $0x30] sm:$0xff]  ;;  %v458_v4 = vld [vmem:[#allocation5 + $0x28] sm:$0xff]  ;;  %s343_s25 = sshll.u32 %s625_s24, 4  ;;  %s344_s25 = int_to_ptr.vmem [resolvable:$true] %s343_s25 }
  0x15   :  { %241 = vmatpush.bf16.msra.mxu1 %v468_v2  ;;  %v466_v5 = vld [vmem:[#allocation7 + $0x28] sm:$0xff]  ;;  %v457_v6 = vld [vmem:[#allocation5 + $0x20] sm:$0xff]  ;;  %v456_v8 = vld [vmem:[#allocation5 + $0x18] sm:$0xff] }
  0x16   :  { %v465_v7 = vld [vmem:[#allocation7 + $0x20] sm:$0xff]  ;;  %v464_v9 = vld [vmem:[#allocation7 + $0x18] sm:$0xff]  ;;  %v455_v10 = vld [vmem:[#allocation5 + $0x10] sm:$0xff] }
  0x17   :  { %v454_v11 = vld [vmem:[#allocation5 + $0x8] sm:$0xff]  ;;  %v453_v12 = vld [vmem:[#allocation5] sm:$0xff]  ;;  %v88_v13 = vld [vmem:[#allocation2] sm:$0xff] }
  0x18   :  { %159 = vmatpush.bf16.msra.mxu0 %v459_v1  ;;  %v89_v14 = vpack.c.bf16 %v88_v13, %v88_v13  ;;  %v463_v15 = vld [vmem:[#allocation7 + $0x10] sm:$0xff]  ;;  %v462_v16 = vld [vmem:[#allocation7 + $0x8] sm:$0xff]  ;;  %v461_v17 = vld [vmem:[#allocation7] sm:$0xff] }
  0x19   :  { %242 = vmatpush.bf16.msra.mxu1 %v467_v3  ;;  %v476_v18 = vld [vmem:[#allocation8 + $0x38] sm:$0xff]  ;;  %v475_v19 = vld [vmem:[#allocation8 + $0x30] sm:$0xff]  ;;  %v474_v20 = vld [vmem:[#allocation8 + $0x28] sm:$0xff] }
  0x1a   :  { %324 = vmatpush.bf16.msra.mxu2 %v476_v18  ;;  %v473_v21 = vld [vmem:[#allocation8 + $0x20] sm:$0xff]  ;;  %v472_v22 = vld [vmem:[#allocation8 + $0x18] sm:$0xff]  ;;  %v471_v29 = vld [vmem:[#allocation8 + $0x10] sm:$0xff] }
  0x1b   :  { %v484_v23 = vld [vmem:[%s692_s2] ss:$0 sm:$0xff]  ;;  %v470_v30 = vld [vmem:[#allocation8 + $0x8] sm:$0xff]  ;;  %v469_v31 = vld [vmem:[#allocation8] sm:$0xff] }
  0x1c   :  { %160 = vmatpush.bf16.msra.mxu0 %v458_v4  ;;  %v485_v32 = vld [vmem:[%s694_s4] ss:$0 sm:$0xff] }
  0x1d   :  { %243 = vmatpush.bf16.msra.mxu1 %v466_v5  ;;  %v486_v38 = vld [vmem:[%s696_s6] ss:$0 sm:$0xff] }
  0x1e   :  { %325 = vmatpush.bf16.msra.mxu2 %v475_v19 }
  0x20   :  { %161 = vmatpush.bf16.msra.mxu0 %v457_v6 }
  0x21   :  { %244 = vmatpush.bf16.msra.mxu1 %v465_v7 }
  0x22   :  { %326 = vmatpush.bf16.msra.mxu2 %v474_v20 }
  0x24   :  { %162 = vmatpush.bf16.msra.mxu0 %v456_v8 }
  0x25   :  { %245 = vmatpush.bf16.msra.mxu1 %v464_v9 }
  0x26   :  { %327 = vmatpush.bf16.msra.mxu2 %v473_v21 }
  0x28   :  { %163 = vmatpush.bf16.msra.mxu0 %v455_v10 }
  0x29   :  { %246 = vmatpush.bf16.msra.mxu1 %v463_v15 }
  0x2a   :  { %328 = vmatpush.bf16.msra.mxu2 %v472_v22 }
  0x2c   :  { %164 = vmatpush.bf16.msra.mxu0 %v454_v11 }
  0x2d   :  { %247 = vmatpush.bf16.msra.mxu1 %v462_v16 }
  0x2e   :  { %329 = vmatpush.bf16.msra.mxu2 %v471_v29 }
  0x30   :  { %165 = vmatpush.bf16.msra.mxu0 %v453_v12 }
  0x31   :  { %248 = vmatpush.bf16.msra.mxu1 %v461_v17 }
  0x32   :  { %330 = vmatpush.bf16.msra.mxu2 %v470_v30 }
  0x33   :  { %166 = vmatmul.bf16.vlgmr.msra.gmra.mxu0 %v89_v14 }
  0x36   :  { %331 = vmatpush.bf16.msra.mxu2 %v469_v31 }
  0xb0   :  { %v167_v24 = vpop.f32.mrf.mxu0 }
  0xb1   :  { %v168_v25 = vadd.f32 %v484_v23, %v167_v24 }
  0xb3   :  { %487 = vtanh.f32 %v168_v25 }
  0xb8   :  { %v169_v26 = vpop.f32.mrf.mxu0 }
  0xb9   :  { %v488_v27 = vpop.eup %487 }
  0xba   :  { %v172_v28 = vpack.c.bf16 %v488_v27, %v488_v27 }
  0xbc   :  { %249 = vmatmul.bf16.vlgmr.msra.gmra.mxu1 %v172_v28 }
 0x139   :  { %v250_v33 = vpop.f32.mrf.mxu1 }
 0x13a   :  { %v251_v34 = vadd.f32 %v485_v32, %v250_v33 }
 0x13c   :  { %489 = vtanh.f32 %v251_v34 }
 0x141   :  { %v252_v35 = vpop.f32.mrf.mxu1 }
 0x142   :  { %v490_v36 = vpop.eup %489 }
 0x143   :  { %v255_v37 = vpack.c.bf16 %v490_v36, %v490_v36 }
 0x145   :  { %332 = vmatmul.bf16.vlgmr.msra.gmra.mxu2 %v255_v37 }
 0x1c8   :  { %v333_v39 = vpop.f32.mrf.mxu2 }
 0x1c9   :  { %v334_v40 = vadd.f32 %v486_v38, %v333_v39 }
 0x1cb   :  { %337 = vst [vmem:[#allocation10] sm:$0xff] %v334_v40 }
 0x1cc   :  { %348 = dma.vmem_to_hbm [thread:$0]  %s344_s25, 128, %s346_s28, [#allocation4]  }
 0x1d0   :  { %v335_v41 = vpop.f32.mrf.mxu2 }
 0x1d1   :  { %617 = dma.done.wait [#allocation4], 128  }
 0x1d2   :  { %618 = vsyncadd [#allocation4], 4294967168 }
 0x1d3   :  { %353 = vsyncpa [#allocation3], 1 }
 0x1d4   :  { %354 = vsyncpa [#allocation6], 1 }
 0x1d5   :  { %355 = vsyncpa [#allocation9], 1 }
 0x1d6   :  { %356 = vsyncpa [#allocation4], 1 }

</bundles_post_ra>
